<compile_context>
chip_gen: v6e
topology: v6e:2x2x1
jax: 0.10.0
libtpu: 0.0.40
codegen_flags: <defaults>
</compile_context>

<pallas_src>
import functools
import math

import jax
import jax.numpy as jnp
from jax import lax
from jax.experimental import pallas as pl
from jax.experimental.pallas import tpu as pltpu

EPS = 1e-5                              # PyTorch LayerNorm default
VMEM_LIMIT = 48 * 1024 * 1024           # > 32 MiB scoped default, < v7x 64 MiB physical VMEM


def _layer_norm(y, w, b):
    # single reduction pass: var = E[y^2] - mean^2 (halves cross-lane XLU work)
    mu = y.mean(axis=-1, keepdims=True)
    ms = (y * y).mean(axis=-1, keepdims=True)
    var = ms - mu * mu
    return (y - mu) * lax.rsqrt(var + EPS) * w + b


# --------------------------------------------------------------------------------------
# Kernel 1: multi-head cross attention + residual + LayerNorm.
# Grid = (batch, Sq tiles).  out = LayerNorm(x_q + MHA(q=x_q, k=x_kv, v=x_kv))
# --------------------------------------------------------------------------------------
def mha_ln_kernel(num_heads,
                  q_ref, kv_ref,
                  wq_ref, bq_ref, wk_ref, bk_ref, wv_ref, bv_ref,
                  wo_ref, bo_ref, lnw_ref, lnb_ref,
                  out_ref, attw_ref):
    nh = num_heads
    xq_f32 = q_ref[0].astype(jnp.float32)               # (tq, H) residual kept in f32
    xq = xq_f32.astype(jnp.bfloat16)
    xkv = kv_ref[0].astype(jnp.bfloat16)                 # (Sk, H)
    tq, H = xq.shape
    hd = H // nh

    # Lane-dense (rows,H)x(H,H) projections on the MXU with f32 accumulation.
    # The 1/sqrt(head_dim) scale is folded into wq / bq at init time.
    Q = jnp.dot(xq, wq_ref[...], preferred_element_type=jnp.float32) + bq_ref[...]
    K = jnp.dot(xkv, wk_ref[...], preferred_element_type=jnp.float32) + bk_ref[...]
    V = jnp.dot(xkv, wv_ref[...], preferred_element_type=jnp.float32) + bv_ref[...]

    Qb = Q.astype(jnp.bfloat16)
    Kb = K.astype(jnp.bfloat16)
    Vb = V.astype(jnp.bfloat16)

    # Per-head lane slices: no (rows, nh, hd) major-axis transpose, heads stay on the lane dim.
    ctx_heads = []
    for h in range(nh):
        sl = slice(h * hd, (h + 1) * hd)
        qh = Qb[:, sl]                                    # (tq, hd)
        kh = Kb[:, sl]                                    # (Sk, hd)
        vh = Vb[:, sl]                                    # (Sk, hd)
        # scores: contract the last dims (no physical K transpose in the kernel source)
        s = lax.dot_general(qh, kh, (((1,), (1,)), ((), ())),
                            preferred_element_type=jnp.float32)          # (tq, Sk)
        m = s.max(axis=-1, keepdims=True)
        e = jnp.exp(s - m)
        probs = e / e.sum(axis=-1, keepdims=True)         # EXACT divide (attw must sum to 1)
        attw_ref[0, h] = probs.astype(attw_ref.dtype)     # direct per-head store
        ctx_heads.append(jnp.dot(probs.astype(jnp.bfloat16), vh,
                                 preferred_element_type=jnp.float32))    # (tq, hd)

    # Lane concat of the per-head contexts -> single lane-dense output projection.
    ctx2d = jnp.concatenate(ctx_heads, axis=-1).astype(jnp.bfloat16)     # (tq, H)
    attn_out = jnp.dot(ctx2d, wo_ref[...],
                       preferred_element_type=jnp.float32) + bo_ref[...]

    y = xq_f32 + attn_out        # residual; dropout = identity (eval mode)
    out_ref[0] = _layer_norm(y, lnw_ref[...], lnb_ref[...]).astype(out_ref.dtype)


def mha_ln_block(xq, xkv, attn_params, ln_w, ln_b, *, num_heads,
                 out_dtype=jnp.bfloat16, tq_cap=128):
    """xq: (B, Sq, H), xkv: (B, Sk, H) -> (out (B,Sq,H) out_dtype, attw (B,nh,Sq,Sk) f32)."""
    B, Sq, H = xq.shape
    _, Sk, _ = xkv.shape
    wq, bq, wk, bk, wv, bv, wo, bo = attn_params
    nh = num_heads

    tq = Sq if Sq <= tq_cap else tq_cap
    n_q = pl.cdiv(Sq, tq)                 # partial last block supported

    full = lambda a: pl.BlockSpec(a.shape, lambda b, i: (0,) * a.ndim)

    out, attw = pl.pallas_call(
        functools.partial(mha_ln_kernel, nh),
        out_shape=(jax.ShapeDtypeStruct((B, Sq, H), out_dtype),
                   jax.ShapeDtypeStruct((B, nh, Sq, Sk), jnp.float32)),
        grid_spec=pltpu.PrefetchScalarGridSpec(
            num_scalar_prefetch=0,
            grid=(B, n_q),                # batch outermost -> KV block fetched once per batch
            in_specs=[
                pl.BlockSpec((1, tq, H), lambda b, i: (b, i, 0)),
                pl.BlockSpec((1, Sk, H), lambda b, i: (b, 0, 0)),
                full(wq), full(bq), full(wk), full(bk),
                full(wv), full(bv), full(wo), full(bo),
                full(ln_w), full(ln_b),
            ],
            out_specs=[
                pl.BlockSpec((1, tq, H), lambda b, i: (b, i, 0)),
                pl.BlockSpec((1, nh, tq, Sk), lambda b, i: (b, 0, i, 0)),
            ],
        ),
        compiler_params=pltpu.CompilerParams(
            dimension_semantics=("parallel", "parallel"),
            vmem_limit_bytes=VMEM_LIMIT),
    )(xq, xkv, wq, bq, wk, bk, wv, bv, wo, bo, ln_w, ln_b)
    return out, attw


# --------------------------------------------------------------------------------------
# Kernel 2: FFN (Linear -> ReLU -> Linear) + residual + LayerNorm.
# --------------------------------------------------------------------------------------
def ffn_ln_kernel(x_ref, w1_ref, b1_ref, w2_ref, b2_ref, lnw_ref, lnb_ref, out_ref):
    x_f32 = x_ref[0].astype(jnp.float32)                                  # (ts, H)
    x = x_f32.astype(jnp.bfloat16)
    h = jnp.dot(x, w1_ref[...], preferred_element_type=jnp.float32) + b1_ref[...]
    h = jnp.maximum(h, 0.0).astype(jnp.bfloat16)                          # ReLU
    f = jnp.dot(h, w2_ref[...], preferred_element_type=jnp.float32) + b2_ref[...]
    y = x_f32 + f                                                         # dropout = identity
    out_ref[0] = _layer_norm(y, lnw_ref[...], lnb_ref[...]).astype(out_ref.dtype)


def ffn_ln_block(x, ffn_params, ln_w, ln_b, *, ts_cap=256, out_dtype=jnp.float32):
    """x: (B, S, H) -> (B, S, H) out_dtype."""
    B, S, H = x.shape
    w1, b1, w2, b2 = ffn_params
    ts = S if S <= ts_cap else ts_cap
    n_s = pl.cdiv(S, ts)

    full = lambda a: pl.BlockSpec(a.shape, lambda b, i: (0,) * a.ndim)

    return pl.pallas_call(
        ffn_ln_kernel,
        out_shape=jax.ShapeDtypeStruct((B, S, H), out_dtype),
        grid_spec=pltpu.PrefetchScalarGridSpec(
            num_scalar_prefetch=0,
            grid=(B, n_s),
            in_specs=[
                pl.BlockSpec((1, ts, H), lambda b, i: (b, i, 0)),
                full(w1), full(b1), full(w2), full(b2),
                full(ln_w), full(ln_b),
            ],
            out_specs=pl.BlockSpec((1, ts, H), lambda b, i: (b, i, 0)),
        ),
        compiler_params=pltpu.CompilerParams(
            dimension_semantics=("parallel", "parallel"),
            vmem_limit_bytes=VMEM_LIMIT),
    )(x, w1, b1, w2, b2, ln_w, ln_b)


# --------------------------------------------------------------------------------------
# Parameter construction (mirrors nn.MultiheadAttention / nn.Linear), kernel-friendly layout.
# --------------------------------------------------------------------------------------
def init_params(key, hidden_dim, num_heads):
    H, nh = hidden_dim, num_heads
    hd = H // nh
    keys = jax.random.split(key, 18)   # 2*4 (MHA) + 3*2 (LN) + 4 (FFN) = 18 keys
    k = iter(keys)
    s = 0.05
    scale = 1.0 / math.sqrt(hd)

    def mha_params():
        # nn.MultiheadAttention: in_proj_weight (3H,H), in_proj_bias (3H,), out_proj (H,H)+(H,)
        in_w = jax.random.normal(next(k), (3 * H, H), jnp.float32) * s
        in_b = jax.random.normal(next(k), (3 * H,), jnp.float32) * s
        out_w = jax.random.normal(next(k), (H, H), jnp.float32) * s
        out_b = jax.random.normal(next(k), (H,), jnp.float32) * s
        wq, wk, wv = in_w[:H], in_w[H:2 * H], in_w[2 * H:]
        bq, bk, bv = in_b[:H], in_b[H:2 * H], in_b[2 * H:]
        # kernel layout: y = x @ W (W = torch_weight.T); 1/sqrt(hd) folded into the Q path.
        return ((wq.T * scale).astype(jnp.bfloat16), (bq * scale).reshape(1, H),
                wk.T.astype(jnp.bfloat16), bk.reshape(1, H),
                wv.T.astype(jnp.bfloat16), bv.reshape(1, H),
                out_w.T.astype(jnp.bfloat16), out_b.reshape(1, H))

    attn_1_to_2 = mha_params()
    attn_2_to_1 = mha_params()

    def ln_params():
        w = jnp.ones((1, H), jnp.float32) + jax.random.normal(next(k), (1, H), jnp.float32) * 0.01
        b = jax.random.normal(next(k), (1, H), jnp.float32) * 0.01
        return w, b

    norm1 = ln_params()
    norm2 = ln_params()
    norm3 = ln_params()

    # FFN: Linear(H, 2H) -> ReLU -> Linear(2H, H); stored transposed (x @ W form), bf16 weights.
    w1 = jax.random.normal(next(k), (2 * H, H), jnp.float32) * s
    b1 = jax.random.normal(next(k), (2 * H,), jnp.float32) * s
    w2 = jax.random.normal(next(k), (H, 2 * H), jnp.float32) * s
    b2 = jax.random.normal(next(k), (H,), jnp.float32) * s
    ffn = (w1.T.astype(jnp.bfloat16), b1.reshape(1, 2 * H),
           w2.T.astype(jnp.bfloat16), b2.reshape(1, H))

    return dict(attn_1_to_2=attn_1_to_2, attn_2_to_1=attn_2_to_1,
                norm1=norm1, norm2=norm2, norm3=norm3, ffn=ffn)


def cross_attention_layer(params, x1, x2, *, num_heads):
    """Forward pass of CrossAttentionLayer (eval mode: dropout = identity)."""
    # MHA+LN outputs are bf16 (intermediate activations -> half the HBM traffic);
    # the final FFN+LN outputs are f32 (module outputs).
    x1_new, w_1_to_2 = mha_ln_block(x1, x2, params["attn_1_to_2"],
                                    *params["norm1"], num_heads=num_heads)
    # attn 2<-1 uses the UPDATED x1 as key/value (matches the PyTorch forward)
    x2_new, w_2_to_1 = mha_ln_block(x2, x1_new, params["attn_2_to_1"],
                                    *params["norm2"], num_heads=num_heads)
    # shared FFN + shared norm3 applied to each stream (no HBM concat round-trip)
    x1_out = ffn_ln_block(x1_new, params["ffn"], *params["norm3"])
    x2_out = ffn_ln_block(x2_new, params["ffn"], *params["norm3"])
    return x1_out, x2_out, w_1_to_2, w_2_to_1


# --------------------------------------------------------------------------------------
# Pure-JAX f32 reference (same bf16-quantized weights, same bf16 inter-kernel handoff).
# --------------------------------------------------------------------------------------
def reference_forward(params, x1, x2, *, num_heads):
    def mha_ln(xq, xkv, p, lnw, lnb):
        wq, bq, wk, bk, wv, bv, wo, bo = [a.astype(jnp.float32) for a in p]
        B, Sq, H = xq.shape
        Sk = xkv.shape[1]
        nh = num_heads
        hd = H // nh
        Q = xq @ wq + bq
        K = xkv @ wk + bk
        V = xkv @ wv + bv
        Qh = Q.reshape(B, Sq, nh, hd).transpose(0, 2, 1, 3)
        Kh = K.reshape(B, Sk, nh, hd).transpose(0, 2, 1, 3)
        Vh = V.reshape(B, Sk, nh, hd).transpose(0, 2, 1, 3)
        scores = jnp.einsum('bnqd,bnkd->bnqk', Qh, Kh)
        probs = jax.nn.softmax(scores, axis=-1)
        ctx = jnp.einsum('bnqk,bnkd->bnqd', probs, Vh)
        ctx2d = ctx.transpose(0, 2, 1, 3).reshape(B, Sq, H)
        y = xq + (ctx2d @ wo + bo)
        return _layer_norm(y, lnw, lnb), probs

    def ffn_ln(x, p, lnw, lnb):
        w1, b1, w2, b2 = [a.astype(jnp.float32) for a in p]
        h = jnp.maximum(x @ w1 + b1, 0.0)
        y = x + (h @ w2 + b2)
        return _layer_norm(y, lnw, lnb)

    quant = lambda a: a.astype(jnp.bfloat16).astype(jnp.float32)   # mirror bf16 handoff

    x1n, w12 = mha_ln(x1, x2, params["attn_1_to_2"], *params["norm1"])
    x1n = quant(x1n)
    x2n, w21 = mha_ln(x2, x1n, params["attn_2_to_1"], *params["norm2"])
    x2n = quant(x2n)
    x1o = ffn_ln(x1n, params["ffn"], *params["norm3"])
    x2o = ffn_ln(x2n, params["ffn"], *params["norm3"])
    return x1o, x2o, w12, w21


if __name__ == "__main__":
    B, S, H, NH = 2, 8, 32, 4   # batch, seq, hidden_dim, num_heads

    key = jax.random.PRNGKey(0)
    k_params, k_x1, k_x2 = jax.random.split(key, 3)
    params = init_params(k_params, H, NH)
    x1 = jax.random.normal(k_x1, (B, S, H), jnp.float32)
    x2 = jax.random.normal(k_x2, (B, S, H), jnp.float32)

    x1_out, x2_out, w12, w21 = cross_attention_layer(params, x1, x2, num_heads=NH)
    jax.block_until_ready((x1_out, x2_out, w12, w21))

    assert x1_out.shape == (B, S, H) and x2_out.shape == (B, S, H)
    assert w12.shape == (B, NH, S, S) and w21.shape == (B, NH, S, S)
    # exact softmax divide -> rows sum to 1 within f32 rounding
    assert bool(jnp.allclose(w12.sum(-1), 1.0, atol=2e-3))
    assert bool(jnp.allclose(w21.sum(-1), 1.0, atol=2e-3))

    # compare against pure-JAX f32 reference using the same (bf16-quantized) weights
    r1, r2, rw12, rw21 = reference_forward(params, x1, x2, num_heads=NH)
    assert bool(jnp.allclose(x1_out, r1, atol=3e-2, rtol=3e-2))
    assert bool(jnp.allclose(x2_out, r2, atol=3e-2, rtol=3e-2))
    assert bool(jnp.allclose(w12, rw12, atol=1e-2))
    assert bool(jnp.allclose(w21, rw21, atol=1e-2))

    print("KERNEL_OK")
</pallas_src>

<mosaic_0001>
module attributes {stable_mosaic.version = 11 : i64} {
  func.func @mha_ln_kernel(%arg0: i32, %arg1: i32, %arg2: memref<1x8x32xf32, #tpu.memory_space<vmem>>, %arg3: memref<1x8x32xf32, #tpu.memory_space<vmem>>, %arg4: memref<32x32xbf16, #tpu.memory_space<vmem>>, %arg5: memref<1x32xf32, #tpu.memory_space<vmem>>, %arg6: memref<32x32xbf16, #tpu.memory_space<vmem>>, %arg7: memref<1x32xf32, #tpu.memory_space<vmem>>, %arg8: memref<32x32xbf16, #tpu.memory_space<vmem>>, %arg9: memref<1x32xf32, #tpu.memory_space<vmem>>, %arg10: memref<32x32xbf16, #tpu.memory_space<vmem>>, %arg11: memref<1x32xf32, #tpu.memory_space<vmem>>, %arg12: memref<1x32xf32, #tpu.memory_space<vmem>>, %arg13: memref<1x32xf32, #tpu.memory_space<vmem>>, %arg14: memref<1x8x32xbf16, #tpu.memory_space<vmem>>, %arg15: memref<1x4x8x8xf32, #tpu.memory_space<vmem>>) attributes {dimension_semantics = [#tpu.dimension_semantics<parallel>, #tpu.dimension_semantics<parallel>], iteration_bounds = array<i64: 2, 1>, scalar_prefetch = 0 : i64, scratch_operands = 0 : i64, tpu.core_type = #tpu.core_type<tc>, window_params = [{transform_indices = @transform_0, window_bounds = array<i64: 1, 8, 32>}, {transform_indices = @transform_1, window_bounds = array<i64: 1, 8, 32>}, {pipeline_mode = #tpu.pipeline_mode<synchronous>, transform_indices = @transform_2, window_bounds = array<i64: 32, 32>}, {pipeline_mode = #tpu.pipeline_mode<synchronous>, transform_indices = @transform_3, window_bounds = array<i64: 1, 32>}, {pipeline_mode = #tpu.pipeline_mode<synchronous>, transform_indices = @transform_4, window_bounds = array<i64: 32, 32>}, {pipeline_mode = #tpu.pipeline_mode<synchronous>, transform_indices = @transform_5, window_bounds = array<i64: 1, 32>}, {pipeline_mode = #tpu.pipeline_mode<synchronous>, transform_indices = @transform_6, window_bounds = array<i64: 32, 32>}, {pipeline_mode = #tpu.pipeline_mode<synchronous>, transform_indices = @transform_7, window_bounds = array<i64: 1, 32>}, {pipeline_mode = #tpu.pipeline_mode<synchronous>, transform_indices = @transform_8, window_bounds = array<i64: 32, 32>}, {pipeline_mode = #tpu.pipeline_mode<synchronous>, transform_indices = @transform_9, window_bounds = array<i64: 1, 32>}, {pipeline_mode = #tpu.pipeline_mode<synchronous>, transform_indices = @transform_10, window_bounds = array<i64: 1, 32>}, {pipeline_mode = #tpu.pipeline_mode<synchronous>, transform_indices = @transform_11, window_bounds = array<i64: 1, 32>}, {transform_indices = @transform_12, window_bounds = array<i64: 1, 8, 32>}, {transform_indices = @transform_13, window_bounds = array<i64: 1, 4, 8, 8>}]} {
    %c0 = arith.constant 0 : index
    %c0_0 = arith.constant 0 : index
    %c0_1 = arith.constant 0 : index
    %0 = vector.load %arg2[%c0, %c0_0, %c0_1] : memref<1x8x32xf32, #tpu.memory_space<vmem>>, vector<1x8x32xf32>
    %1 = vector.shape_cast %0 : vector<1x8x32xf32> to vector<8x32xf32>
    %2 = arith.truncf %1 : vector<8x32xf32> to vector<8x32xbf16>
    %c0_2 = arith.constant 0 : index
    %c0_3 = arith.constant 0 : index
    %c0_4 = arith.constant 0 : index
    %3 = vector.load %arg3[%c0_2, %c0_3, %c0_4] : memref<1x8x32xf32, #tpu.memory_space<vmem>>, vector<1x8x32xf32>
    %4 = vector.shape_cast %3 : vector<1x8x32xf32> to vector<8x32xf32>
    %5 = arith.truncf %4 : vector<8x32xf32> to vector<8x32xbf16>
    %c0_5 = arith.constant 0 : index
    %c0_6 = arith.constant 0 : index
    %6 = vector.load %arg4[%c0_5, %c0_6] : memref<32x32xbf16, #tpu.memory_space<vmem>>, vector<32x32xbf16>
    %cst = arith.constant dense<0.000000e+00> : vector<8x32xf32>
    %7 = tpu.matmul %2, %6, %cst {dimension_numbers = #tpu.dot_dimension_numbers<[1], [0], [0], [1], [0, 0, 1, 1], [], []>} : vector<8x32xbf16>, vector<32x32xbf16>, vector<8x32xf32> -> vector<8x32xf32>
    %c0_7 = arith.constant 0 : index
    %c0_8 = arith.constant 0 : index
    %8 = vector.load %arg5[%c0_7, %c0_8] : memref<1x32xf32, #tpu.memory_space<vmem>>, vector<1x32xf32>
    %9 = vector.broadcast %8 : vector<1x32xf32> to vector<8x32xf32>
    %10 = arith.addf %7, %9 : vector<8x32xf32>
    %c0_9 = arith.constant 0 : index
    %c0_10 = arith.constant 0 : index
    %11 = vector.load %arg6[%c0_9, %c0_10] : memref<32x32xbf16, #tpu.memory_space<vmem>>, vector<32x32xbf16>
    %cst_11 = arith.constant dense<0.000000e+00> : vector<8x32xf32>
    %12 = tpu.matmul %5, %11, %cst_11 {dimension_numbers = #tpu.dot_dimension_numbers<[1], [0], [0], [1], [0, 0, 1, 1], [], []>} : vector<8x32xbf16>, vector<32x32xbf16>, vector<8x32xf32> -> vector<8x32xf32>
    %c0_12 = arith.constant 0 : index
    %c0_13 = arith.constant 0 : index
    %13 = vector.load %arg7[%c0_12, %c0_13] : memref<1x32xf32, #tpu.memory_space<vmem>>, vector<1x32xf32>
    %14 = vector.broadcast %13 : vector<1x32xf32> to vector<8x32xf32>
    %15 = arith.addf %12, %14 : vector<8x32xf32>
    %c0_14 = arith.constant 0 : index
    %c0_15 = arith.constant 0 : index
    %16 = vector.load %arg8[%c0_14, %c0_15] : memref<32x32xbf16, #tpu.memory_space<vmem>>, vector<32x32xbf16>
    %cst_16 = arith.constant dense<0.000000e+00> : vector<8x32xf32>
    %17 = tpu.matmul %5, %16, %cst_16 {dimension_numbers = #tpu.dot_dimension_numbers<[1], [0], [0], [1], [0, 0, 1, 1], [], []>} : vector<8x32xbf16>, vector<32x32xbf16>, vector<8x32xf32> -> vector<8x32xf32>
    %c0_17 = arith.constant 0 : index
    %c0_18 = arith.constant 0 : index
    %18 = vector.load %arg9[%c0_17, %c0_18] : memref<1x32xf32, #tpu.memory_space<vmem>>, vector<1x32xf32>
    %19 = vector.broadcast %18 : vector<1x32xf32> to vector<8x32xf32>
    %20 = arith.addf %17, %19 : vector<8x32xf32>
    %21 = arith.truncf %10 : vector<8x32xf32> to vector<8x32xbf16>
    %22 = arith.truncf %15 : vector<8x32xf32> to vector<8x32xbf16>
    %23 = arith.truncf %20 : vector<8x32xf32> to vector<8x32xbf16>
    %24 = vector.extract_strided_slice %21 {offsets = [0, 0], sizes = [8, 8], strides = [1, 1]} : vector<8x32xbf16> to vector<8x8xbf16>
    %25 = vector.extract_strided_slice %22 {offsets = [0, 0], sizes = [8, 8], strides = [1, 1]} : vector<8x32xbf16> to vector<8x8xbf16>
    %26 = vector.extract_strided_slice %23 {offsets = [0, 0], sizes = [8, 8], strides = [1, 1]} : vector<8x32xbf16> to vector<8x8xbf16>
    %cst_19 = arith.constant dense<0.000000e+00> : vector<8x8xf32>
    %27 = tpu.matmul %24, %25, %cst_19 {dimension_numbers = #tpu.dot_dimension_numbers<[1], [1], [0], [0], [0, 0, 1, 0], [], []>} : vector<8x8xbf16>, vector<8x8xbf16>, vector<8x8xf32> -> vector<8x8xf32>
    %cst_20 = arith.constant dense<0xFF800000> : vector<8xf32>
    %28 = vector.multi_reduction <maximumf>, %27, %cst_20 [1] : vector<8x8xf32> to vector<8xf32>
    %29 = vector.shape_cast %28 : vector<8xf32> to vector<8x1xf32>
    %30 = vector.broadcast %29 : vector<8x1xf32> to vector<8x8xf32>
    %31 = arith.subf %27, %30 : vector<8x8xf32>
    %32 = math.exp %31 : vector<8x8xf32>
    %cst_21 = arith.constant dense<0.000000e+00> : vector<8xf32>
    %33 = vector.multi_reduction <add>, %32, %cst_21 [1] : vector<8x8xf32> to vector<8xf32>
    %34 = vector.shape_cast %33 : vector<8xf32> to vector<8x1xf32>
    %35 = vector.broadcast %34 : vector<8x1xf32> to vector<8x8xf32>
    %36 = arith.divf %32, %35 : vector<8x8xf32>
    %c0_22 = arith.constant 0 : index
    %c0_23 = arith.constant 0 : index
    %c0_24 = arith.constant 0 : index
    %c0_25 = arith.constant 0 : index
    %37 = vector.load %arg15[%c0_22, %c0_23, %c0_24, %c0_25] : memref<1x4x8x8xf32, #tpu.memory_space<vmem>>, vector<1x1x8x8xf32>
    %38 = vector.shape_cast %37 : vector<1x1x8x8xf32> to vector<8x8xf32>
    %39 = vector.shape_cast %36 : vector<8x8xf32> to vector<1x1x8x8xf32>
    tpu.vector_store %arg15[%c0_22, %c0_23, %c0_24, %c0_25], %39 {strides = array<i32>} : memref<1x4x8x8xf32, #tpu.memory_space<vmem>>, vector<1x1x8x8xf32>,
    %40 = arith.truncf %36 : vector<8x8xf32> to vector<8x8xbf16>
    %cst_26 = arith.constant dense<0.000000e+00> : vector<8x8xf32>
    %41 = tpu.matmul %40, %26, %cst_26 {dimension_numbers = #tpu.dot_dimension_numbers<[1], [0], [0], [1], [0, 0, 1, 1], [], []>} : vector<8x8xbf16>, vector<8x8xbf16>, vector<8x8xf32> -> vector<8x8xf32>
    %42 = vector.extract_strided_slice %21 {offsets = [0, 8], sizes = [8, 8], strides = [1, 1]} : vector<8x32xbf16> to vector<8x8xbf16>
    %43 = vector.extract_strided_slice %22 {offsets = [0, 8], sizes = [8, 8], strides = [1, 1]} : vector<8x32xbf16> to vector<8x8xbf16>
    %44 = vector.extract_strided_slice %23 {offsets = [0, 8], sizes = [8, 8], strides = [1, 1]} : vector<8x32xbf16> to vector<8x8xbf16>
    %cst_27 = arith.constant dense<0.000000e+00> : vector<8x8xf32>
    %45 = tpu.matmul %42, %43, %cst_27 {dimension_numbers = #tpu.dot_dimension_numbers<[1], [1], [0], [0], [0, 0, 1, 0], [], []>} : vector<8x8xbf16>, vector<8x8xbf16>, vector<8x8xf32> -> vector<8x8xf32>
    %cst_28 = arith.constant dense<0xFF800000> : vector<8xf32>
    %46 = vector.multi_reduction <maximumf>, %45, %cst_28 [1] : vector<8x8xf32> to vector<8xf32>
    %47 = vector.shape_cast %46 : vector<8xf32> to vector<8x1xf32>
    %48 = vector.broadcast %47 : vector<8x1xf32> to vector<8x8xf32>
    %49 = arith.subf %45, %48 : vector<8x8xf32>
    %50 = math.exp %49 : vector<8x8xf32>
    %cst_29 = arith.constant dense<0.000000e+00> : vector<8xf32>
    %51 = vector.multi_reduction <add>, %50, %cst_29 [1] : vector<8x8xf32> to vector<8xf32>
    %52 = vector.shape_cast %51 : vector<8xf32> to vector<8x1xf32>
    %53 = vector.broadcast %52 : vector<8x1xf32> to vector<8x8xf32>
    %54 = arith.divf %50, %53 : vector<8x8xf32>
    %c0_30 = arith.constant 0 : index
    %c1 = arith.constant 1 : index
    %c0_31 = arith.constant 0 : index
    %c0_32 = arith.constant 0 : index
    %55 = vector.load %arg15[%c0_30, %c1, %c0_31, %c0_32] : memref<1x4x8x8xf32, #tpu.memory_space<vmem>>, vector<1x1x8x8xf32>
    %56 = vector.shape_cast %55 : vector<1x1x8x8xf32> to vector<8x8xf32>
    %57 = vector.shape_cast %54 : vector<8x8xf32> to vector<1x1x8x8xf32>
    tpu.vector_store %arg15[%c0_30, %c1, %c0_31, %c0_32], %57 {strides = array<i32>} : memref<1x4x8x8xf32, #tpu.memory_space<vmem>>, vector<1x1x8x8xf32>,
    %58 = arith.truncf %54 : vector<8x8xf32> to vector<8x8xbf16>
    %cst_33 = arith.constant dense<0.000000e+00> : vector<8x8xf32>
    %59 = tpu.matmul %58, %44, %cst_33 {dimension_numbers = #tpu.dot_dimension_numbers<[1], [0], [0], [1], [0, 0, 1, 1], [], []>} : vector<8x8xbf16>, vector<8x8xbf16>, vector<8x8xf32> -> vector<8x8xf32>
    %60 = vector.extract_strided_slice %21 {offsets = [0, 16], sizes = [8, 8], strides = [1, 1]} : vector<8x32xbf16> to vector<8x8xbf16>
    %61 = vector.extract_strided_slice %22 {offsets = [0, 16], sizes = [8, 8], strides = [1, 1]} : vector<8x32xbf16> to vector<8x8xbf16>
    %62 = vector.extract_strided_slice %23 {offsets = [0, 16], sizes = [8, 8], strides = [1, 1]} : vector<8x32xbf16> to vector<8x8xbf16>
    %cst_34 = arith.constant dense<0.000000e+00> : vector<8x8xf32>
    %63 = tpu.matmul %60, %61, %cst_34 {dimension_numbers = #tpu.dot_dimension_numbers<[1], [1], [0], [0], [0, 0, 1, 0], [], []>} : vector<8x8xbf16>, vector<8x8xbf16>, vector<8x8xf32> -> vector<8x8xf32>
    %cst_35 = arith.constant dense<0xFF800000> : vector<8xf32>
    %64 = vector.multi_reduction <maximumf>, %63, %cst_35 [1] : vector<8x8xf32> to vector<8xf32>
    %65 = vector.shape_cast %64 : vector<8xf32> to vector<8x1xf32>
    %66 = vector.broadcast %65 : vector<8x1xf32> to vector<8x8xf32>
    %67 = arith.subf %63, %66 : vector<8x8xf32>
    %68 = math.exp %67 : vector<8x8xf32>
    %cst_36 = arith.constant dense<0.000000e+00> : vector<8xf32>
    %69 = vector.multi_reduction <add>, %68, %cst_36 [1] : vector<8x8xf32> to vector<8xf32>
    %70 = vector.shape_cast %69 : vector<8xf32> to vector<8x1xf32>
    %71 = vector.broadcast %70 : vector<8x1xf32> to vector<8x8xf32>
    %72 = arith.divf %68, %71 : vector<8x8xf32>
    %c0_37 = arith.constant 0 : index
    %c2 = arith.constant 2 : index
    %c0_38 = arith.constant 0 : index
    %c0_39 = arith.constant 0 : index
    %73 = vector.load %arg15[%c0_37, %c2, %c0_38, %c0_39] : memref<1x4x8x8xf32, #tpu.memory_space<vmem>>, vector<1x1x8x8xf32>
    %74 = vector.shape_cast %73 : vector<1x1x8x8xf32> to vector<8x8xf32>
    %75 = vector.shape_cast %72 : vector<8x8xf32> to vector<1x1x8x8xf32>
    tpu.vector_store %arg15[%c0_37, %c2, %c0_38, %c0_39], %75 {strides = array<i32>} : memref<1x4x8x8xf32, #tpu.memory_space<vmem>>, vector<1x1x8x8xf32>,
    %76 = arith.truncf %72 : vector<8x8xf32> to vector<8x8xbf16>
    %cst_40 = arith.constant dense<0.000000e+00> : vector<8x8xf32>
    %77 = tpu.matmul %76, %62, %cst_40 {dimension_numbers = #tpu.dot_dimension_numbers<[1], [0], [0], [1], [0, 0, 1, 1], [], []>} : vector<8x8xbf16>, vector<8x8xbf16>, vector<8x8xf32> -> vector<8x8xf32>
    %78 = vector.extract_strided_slice %21 {offsets = [0, 24], sizes = [8, 8], strides = [1, 1]} : vector<8x32xbf16> to vector<8x8xbf16>
    %79 = vector.extract_strided_slice %22 {offsets = [0, 24], sizes = [8, 8], strides = [1, 1]} : vector<8x32xbf16> to vector<8x8xbf16>
    %80 = vector.extract_strided_slice %23 {offsets = [0, 24], sizes = [8, 8], strides = [1, 1]} : vector<8x32xbf16> to vector<8x8xbf16>
    %cst_41 = arith.constant dense<0.000000e+00> : vector<8x8xf32>
    %81 = tpu.matmul %78, %79, %cst_41 {dimension_numbers = #tpu.dot_dimension_numbers<[1], [1], [0], [0], [0, 0, 1, 0], [], []>} : vector<8x8xbf16>, vector<8x8xbf16>, vector<8x8xf32> -> vector<8x8xf32>
    %cst_42 = arith.constant dense<0xFF800000> : vector<8xf32>
    %82 = vector.multi_reduction <maximumf>, %81, %cst_42 [1] : vector<8x8xf32> to vector<8xf32>
    %83 = vector.shape_cast %82 : vector<8xf32> to vector<8x1xf32>
    %84 = vector.broadcast %83 : vector<8x1xf32> to vector<8x8xf32>
    %85 = arith.subf %81, %84 : vector<8x8xf32>
    %86 = math.exp %85 : vector<8x8xf32>
    %cst_43 = arith.constant dense<0.000000e+00> : vector<8xf32>
    %87 = vector.multi_reduction <add>, %86, %cst_43 [1] : vector<8x8xf32> to vector<8xf32>
    %88 = vector.shape_cast %87 : vector<8xf32> to vector<8x1xf32>
    %89 = vector.broadcast %88 : vector<8x1xf32> to vector<8x8xf32>
    %90 = arith.divf %86, %89 : vector<8x8xf32>
    %c0_44 = arith.constant 0 : index
    %c3 = arith.constant 3 : index
    %c0_45 = arith.constant 0 : index
    %c0_46 = arith.constant 0 : index
    %91 = vector.load %arg15[%c0_44, %c3, %c0_45, %c0_46] : memref<1x4x8x8xf32, #tpu.memory_space<vmem>>, vector<1x1x8x8xf32>
    %92 = vector.shape_cast %91 : vector<1x1x8x8xf32> to vector<8x8xf32>
    %93 = vector.shape_cast %90 : vector<8x8xf32> to vector<1x1x8x8xf32>
    tpu.vector_store %arg15[%c0_44, %c3, %c0_45, %c0_46], %93 {strides = array<i32>} : memref<1x4x8x8xf32, #tpu.memory_space<vmem>>, vector<1x1x8x8xf32>,
    %94 = arith.truncf %90 : vector<8x8xf32> to vector<8x8xbf16>
    %cst_47 = arith.constant dense<0.000000e+00> : vector<8x8xf32>
    %95 = tpu.matmul %94, %80, %cst_47 {dimension_numbers = #tpu.dot_dimension_numbers<[1], [0], [0], [1], [0, 0, 1, 1], [], []>} : vector<8x8xbf16>, vector<8x8xbf16>, vector<8x8xf32> -> vector<8x8xf32>
    %96 = tpu.concatenate %41, %59, %77, %95 in 1 : vector<8x8xf32>, vector<8x8xf32>, vector<8x8xf32>, vector<8x8xf32> -> vector<8x32xf32>
    %97 = arith.truncf %96 : vector<8x32xf32> to vector<8x32xbf16>
    %c0_48 = arith.constant 0 : index
    %c0_49 = arith.constant 0 : index
    %98 = vector.load %arg10[%c0_48, %c0_49] : memref<32x32xbf16, #tpu.memory_space<vmem>>, vector<32x32xbf16>
    %cst_50 = arith.constant dense<0.000000e+00> : vector<8x32xf32>
    %99 = tpu.matmul %97, %98, %cst_50 {dimension_numbers = #tpu.dot_dimension_numbers<[1], [0], [0], [1], [0, 0, 1, 1], [], []>} : vector<8x32xbf16>, vector<32x32xbf16>, vector<8x32xf32> -> vector<8x32xf32>
    %c0_51 = arith.constant 0 : index
    %c0_52 = arith.constant 0 : index
    %100 = vector.load %arg11[%c0_51, %c0_52] : memref<1x32xf32, #tpu.memory_space<vmem>>, vector<1x32xf32>
    %101 = vector.broadcast %100 : vector<1x32xf32> to vector<8x32xf32>
    %102 = arith.addf %99, %101 : vector<8x32xf32>
    %103 = arith.addf %1, %102 : vector<8x32xf32>
    %c0_53 = arith.constant 0 : index
    %c0_54 = arith.constant 0 : index
    %104 = vector.load %arg12[%c0_53, %c0_54] : memref<1x32xf32, #tpu.memory_space<vmem>>, vector<1x32xf32>
    %c0_55 = arith.constant 0 : index
    %c0_56 = arith.constant 0 : index
    %105 = vector.load %arg13[%c0_55, %c0_56] : memref<1x32xf32, #tpu.memory_space<vmem>>, vector<1x32xf32>
    %cst_57 = arith.constant dense<0.000000e+00> : vector<8xf32>
    %106 = vector.multi_reduction <add>, %103, %cst_57 [1] : vector<8x32xf32> to vector<8xf32>
    %107 = vector.shape_cast %106 : vector<8xf32> to vector<8x1xf32>
    %cst_58 = arith.constant 3.200000e+01 : f32
    %108 = vector.broadcast %cst_58 : f32 to vector<8x1xf32>
    %109 = arith.divf %107, %108 : vector<8x1xf32>
    %110 = arith.mulf %103, %103 : vector<8x32xf32>
    %cst_59 = arith.constant dense<0.000000e+00> : vector<8xf32>
    %111 = vector.multi_reduction <add>, %110, %cst_59 [1] : vector<8x32xf32> to vector<8xf32>
    %112 = vector.shape_cast %111 : vector<8xf32> to vector<8x1xf32>
    %cst_60 = arith.constant 3.200000e+01 : f32
    %113 = vector.broadcast %cst_60 : f32 to vector<8x1xf32>
    %114 = arith.divf %112, %113 : vector<8x1xf32>
    %115 = arith.mulf %109, %109 : vector<8x1xf32>
    %116 = arith.subf %114, %115 : vector<8x1xf32>
    %117 = vector.broadcast %109 : vector<8x1xf32> to vector<8x32xf32>
    %118 = arith.subf %103, %117 : vector<8x32xf32>
    %cst_61 = arith.constant 9.99999974E-6 : f32
    %119 = vector.broadcast %cst_61 : f32 to vector<8x1xf32>
    %120 = arith.addf %116, %119 : vector<8x1xf32>
    %121 = math.rsqrt %120 : vector<8x1xf32>
    %122 = vector.broadcast %121 : vector<8x1xf32> to vector<8x32xf32>
    %123 = arith.mulf %118, %122 : vector<8x32xf32>
    %124 = vector.broadcast %104 : vector<1x32xf32> to vector<8x32xf32>
    %125 = arith.mulf %123, %124 : vector<8x32xf32>
    %126 = vector.broadcast %105 : vector<1x32xf32> to vector<8x32xf32>
    %127 = arith.addf %125, %126 : vector<8x32xf32>
    %128 = arith.truncf %127 : vector<8x32xf32> to vector<8x32xbf16>
    %c0_62 = arith.constant 0 : index
    %c0_63 = arith.constant 0 : index
    %c0_64 = arith.constant 0 : index
    %129 = vector.load %arg14[%c0_62, %c0_63, %c0_64] : memref<1x8x32xbf16, #tpu.memory_space<vmem>>, vector<1x8x32xbf16>
    %130 = vector.shape_cast %129 : vector<1x8x32xbf16> to vector<8x32xbf16>
    %131 = vector.shape_cast %128 : vector<8x32xbf16> to vector<1x8x32xbf16>
    tpu.vector_store %arg14[%c0_62, %c0_63, %c0_64], %131 {strides = array<i32>} : memref<1x8x32xbf16, #tpu.memory_space<vmem>>, vector<1x8x32xbf16>,
    return
  }
  func.func @transform_0(%arg0: i32, %arg1: i32) -> (i32, i32, i32) {
    %c0_i32 = arith.constant 0 : i32
    %c0_i32_0 = arith.constant 0 : i32
    return %arg0, %arg1, %c0_i32 : i32, i32, i32
  }
  func.func @transform_1(%arg0: i32, %arg1: i32) -> (i32, i32, i32) {
    %c0_i32 = arith.constant 0 : i32
    %c0_i32_0 = arith.constant 0 : i32
    %c0_i32_1 = arith.constant 0 : i32
    return %arg0, %c0_i32, %c0_i32_0 : i32, i32, i32
  }
  func.func @transform_2(%arg0: i32, %arg1: i32) -> (i32, i32) {
    %c0_i32 = arith.constant 0 : i32
    %c0_i32_0 = arith.constant 0 : i32
    %c0_i32_1 = arith.constant 0 : i32
    return %c0_i32, %c0_i32_0 : i32, i32
  }
  func.func @transform_3(%arg0: i32, %arg1: i32) -> (i32, i32) {
    %c0_i32 = arith.constant 0 : i32
    %c0_i32_0 = arith.constant 0 : i32
    %c0_i32_1 = arith.constant 0 : i32
    return %c0_i32, %c0_i32_0 : i32, i32
  }
  func.func @transform_4(%arg0: i32, %arg1: i32) -> (i32, i32) {
    %c0_i32 = arith.constant 0 : i32
    %c0_i32_0 = arith.constant 0 : i32
    %c0_i32_1 = arith.constant 0 : i32
    return %c0_i32, %c0_i32_0 : i32, i32
  }
  func.func @transform_5(%arg0: i32, %arg1: i32) -> (i32, i32) {
    %c0_i32 = arith.constant 0 : i32
    %c0_i32_0 = arith.constant 0 : i32
    %c0_i32_1 = arith.constant 0 : i32
    return %c0_i32, %c0_i32_0 : i32, i32
  }
  func.func @transform_6(%arg0: i32, %arg1: i32) -> (i32, i32) {
    %c0_i32 = arith.constant 0 : i32
    %c0_i32_0 = arith.constant 0 : i32
    %c0_i32_1 = arith.constant 0 : i32
    return %c0_i32, %c0_i32_0 : i32, i32
  }
  func.func @transform_7(%arg0: i32, %arg1: i32) -> (i32, i32) {
    %c0_i32 = arith.constant 0 : i32
    %c0_i32_0 = arith.constant 0 : i32
    %c0_i32_1 = arith.constant 0 : i32
    return %c0_i32, %c0_i32_0 : i32, i32
  }
  func.func @transform_8(%arg0: i32, %arg1: i32) -> (i32, i32) {
    %c0_i32 = arith.constant 0 : i32
    %c0_i32_0 = arith.constant 0 : i32
    %c0_i32_1 = arith.constant 0 : i32
    return %c0_i32, %c0_i32_0 : i32, i32
  }
  func.func @transform_9(%arg0: i32, %arg1: i32) -> (i32, i32) {
    %c0_i32 = arith.constant 0 : i32
    %c0_i32_0 = arith.constant 0 : i32
    %c0_i32_1 = arith.constant 0 : i32
    return %c0_i32, %c0_i32_0 : i32, i32
  }
  func.func @transform_10(%arg0: i32, %arg1: i32) -> (i32, i32) {
    %c0_i32 = arith.constant 0 : i32
    %c0_i32_0 = arith.constant 0 : i32
    %c0_i32_1 = arith.constant 0 : i32
    return %c0_i32, %c0_i32_0 : i32, i32
  }
  func.func @transform_11(%arg0: i32, %arg1: i32) -> (i32, i32) {
    %c0_i32 = arith.constant 0 : i32
    %c0_i32_0 = arith.constant 0 : i32
    %c0_i32_1 = arith.constant 0 : i32
    return %c0_i32, %c0_i32_0 : i32, i32
  }
  func.func @transform_12(%arg0: i32, %arg1: i32) -> (i32, i32, i32) {
    %c0_i32 = arith.constant 0 : i32
    %c0_i32_0 = arith.constant 0 : i32
    return %arg0, %arg1, %c0_i32 : i32, i32, i32
  }
  func.func @transform_13(%arg0: i32, %arg1: i32) -> (i32, i32, i32, i32) {
    %c0_i32 = arith.constant 0 : i32
    %c0_i32_0 = arith.constant 0 : i32
    %c0_i32_1 = arith.constant 0 : i32
    return %arg0, %c0_i32, %arg1, %c0_i32_0 : i32, i32, i32, i32
  }
}

</mosaic_0001>

<bundles_post_ra>
// kernel: tpu_custom_call.1
= control target key start
LH: loop header
LB: loop body
LE: loop exit
PB: predicated region body
PF: predicated region fallthrough
CT: control target
= control target key end

     0   :  { %s2633_s0 = inlined_call_operand.hbm [shape: f32[2,8,32], index: 0, kind: input, shape index: {}]   ;;  %s2634_s1 = inlined_call_operand.hbm [shape: f32[2,8,32], index: 1, kind: input, shape index: {}]   ;;  %s2635_s2 = inlined_call_operand.hbm [shape: bf16[32,32], index: 2, kind: input, shape index: {}]   ;;  %s2636_s3 = inlined_call_operand.vmem [shape: f32[1,32], index: 3, kind: input, shape index: {}]   ;;  %s2637_s4 = inlined_call_operand.hbm [shape: bf16[32,32], index: 4, kind: input, shape index: {}]   ;;  %s2638_s5 = inlined_call_operand.vmem [shape: f32[1,32], index: 5, kind: input, shape index: {}]   ;;  %s2639_s6 = inlined_call_operand.hbm [shape: bf16[32,32], index: 6, kind: input, shape index: {}]   ;;  %s2640_s7 = inlined_call_operand.vmem [shape: f32[1,32], index: 7, kind: input, shape index: {}]   ;;  %s2641_s8 = inlined_call_operand.hbm [shape: bf16[32,32], index: 8, kind: input, shape index: {}]   ;;  %s2642_s9 = inlined_call_operand.vmem [shape: f32[1,32], index: 9, kind: input, shape index: {}]   ;;  %s2643_s10 = inlined_call_operand.vmem [shape: f32[1,32], index: 10, kind: input, shape index: {}]   ;;  %s2644_s11 = inlined_call_operand.vmem [shape: f32[1,32], index: 11, kind: input, shape index: {}]   ;;  %s2645_s12 = inlined_call_operand.hbm [shape: bf16[2,8,32], index: 12, kind: output, shape index: {0}]   ;;  %s2646_s13 = inlined_call_operand.hbm [shape: f32[2,4,8,8], index: 13, kind: output, shape index: {1}]  }
   0x1   :  { %2652 = sst [smem:[#allocation27_spill]] %s2633_s0 }
   0x2   :  { %2653 = sst [smem:[#allocation28_spill]] %s2635_s2 }
   0x3   :  { %2654 = sst [smem:[#allocation29_spill]] %s2637_s4 }
   0x4   :  { %2655 = sst [smem:[#allocation30_spill]] %s2639_s6 }
   0x5   :  { %2656 = sst [smem:[#allocation31_spill]] %s2641_s8 }
   0x6   :  { %2657 = sst [smem:[#allocation32_spill]] %s2644_s11 }
   0x7   :  { %2658 = sst [smem:[#allocation33_spill]] %s2645_s12 }
   0x8   :  { %19 = vsyncpa [#allocation3], 0 }
   0x9   :  { %21 = vsyncpa [#allocation3 + $0x1], 0 }
   0xa   :  { %22 = vsyncpa [#allocation6], 0 }
   0xb   :  { %24 = vsyncpa [#allocation6 + $0x1], 0 }
   0xc   :  { %25 = vsyncpa [#allocation9], 0 }
   0xd   :  { %26 = vsyncpa [#allocation12], 0 }
   0xe   :  { %27 = vsyncpa [#allocation4], 0 }
   0xf   :  { %29 = vsyncpa [#allocation4 + $0x1], 0 }
  0x10   :  { %30 = vsyncpa [#allocation15], 0 }
  0x11   :  { %32 = vsyncpa [#allocation15 + $0x1], 0  ;;  %s2256_s25 = smov 0   ;;  %s2258_s26 = smov 0  }
  0x12   :  { %s2260_s27 = smov 0   ;;  %s2262_s28 = smov 0  }
  0x13   :  { %s2264_s29 = smov 0   ;;  %s2266_s30 = smov 0  }
  0x14 LB: > { %2659 = sst [smem:[#allocation23_spill]] %s2145_s25  ;;  %s2287_s14 = sadd.s32 4294967295, %s2165_s30   ;;  %s2165_s30 = sphi %s2266_s30, %s38_s30   ;;  %s2161_s29 = sphi %s2264_s29, %s2687_s29   ;;  %s2157_s28 = sphi %s2262_s28, %s2686_s28   ;;  %s2153_s27 = sphi %s2260_s27, %s2690_s27   ;;  %s2149_s26 = sphi %s2258_s26, %s2689_s26   ;;  %s2145_s25 = sphi %s2256_s25, %s2688_s25  }
  0x15   : > { %2660 = sst [smem:[#allocation24_spill]] %s2161_s29  ;;  %p1565_p0 = scmp.ge.s32.totalorder %s2165_s30, 1 }
  0x16   : > { %p2651_p1 = scmp.eq.s32.totalorder %s2287_s14, 0  ;;  %p375_p2 = scmp.lt.s32.totalorder %s2165_s30, 3 }
  0x17   : > { %s2167_s16 = smov [#allocation7]   ;;  %s2168_s19 = smov [#allocation8]  }
  0x18   : > { %p2292_p3 = pnand %p1565_p0, %p375_p2  ;;  %s387_s17 = sshll.u32 %s2167_s16, 4  ;;  %s388_s17 = int_to_ptr.vmem [resolvable:$true] %s387_s17 }
  0x19   : > { %s403_s20 = sshll.u32 %s2168_s19, 4  ;;  %s2169_s21 = smov [#allocation10]   ;;  %s404_s20 = int_to_ptr.vmem [resolvable:$true] %s403_s20 }
  0x1a   : > { %p1753_p4 = pneg %p2292_p3  ;;  %s419_s22 = sshll.u32 %s2169_s21, 4  ;;  %s420_s22 = int_to_ptr.vmem [resolvable:$true] %s419_s22 }
  0x1b   : > { %s1890_s23 = scalar_lea.vmem %s388_s17, 256  ;;  %p1898_p11 = scmp.lt.s32.totalorder %s388_s17, %s388_s17 }
  0x1c   : > { %p2301_p6 = pnand %p1753_p4, %p2651_p1  ;;  %p1891_p8 = scmp.ne.s32.totalorder %s388_s17, %s1890_s23 }
  0x1d   : > { %p1899_p12 = scmp.lt.s32.totalorder %s1890_s23, %s1890_s23 }
  0x1e   : > { %p1881_p7 = pneg %p2301_p6 }
  0x1f   : > { %p1900_p13 = por %p1899_p12, %p1898_p11 }
  0x20   : > { %p1893_p9 = pnand %p1891_p8, %p1881_p7 }
  0x22   : > { %p1894_p10 = pneg %p1893_p9 }
  0x24   : > { %p1901_p0 = pnand %p1900_p13, %p1894_p10 }
  0x26   : > { %1904 = shalt.err (!%p1901_p0)
}
  0x27   : > { %s2170_s24 = smov 64   ;;  %s2171_s16 = smov 4  }
  0x28   : > { %s2663_s2 = sld [smem:[#allocation28_spill]]  ;;  %s1916_s12 = scalar_lea.vmem %s404_s20, 256 }
  0x29   : > { %p1917_p2 = scmp.ne.s32.totalorder %s404_s20, %s1916_s12  ;;  %p1924_p9 = scmp.lt.s32.totalorder %s404_s20, %s404_s20 }
  0x2a   : > { %p1925_p10 = scmp.lt.s32.totalorder %s1916_s12, %s1916_s12 }
  0x2b   : > { %p1919_p4 = pnand %p1917_p2, %p1881_p7 }
  0x2c   : > { %p1926_p11 = por %p1925_p10, %p1924_p9 }
  0x2d   : > { %p1920_p8 = pneg %p1919_p4 }
  0x2e   : > { %1756 = dma.hbm_to_vmem [thread:$0]  (!%p2301_p6), %s2663_s2, 256, %s388_s17, [#allocation6], %s2170_s24, %s2170_s24, %s2171_s16  }
  0x2f   : > { %p1927_p12 = pnand %p1926_p11, %p1920_p8 }
  0x31   : > { %1930 = shalt.err (!%p1927_p12)
}
  0x32   : > { %s2664_s4 = sld [smem:[#allocation29_spill]]  ;;  %s1942_s17 = scalar_lea.vmem %s420_s22, 256 }
  0x33   : > { %p1943_p13 = scmp.ne.s32.totalorder %s420_s22, %s1942_s17  ;;  %p1950_p4 = scmp.lt.s32.totalorder %s420_s22, %s420_s22 }
  0x34   : > { %p1951_p8 = scmp.lt.s32.totalorder %s1942_s17, %s1942_s17 }
  0x35   : > { %p1945_p0 = pnand %p1943_p13, %p1881_p7 }
  0x36   : > { %p1952_p9 = por %p1951_p8, %p1950_p4 }
  0x37   : > { %p1946_p2 = pneg %p1945_p0 }
  0x38   : > { %1759 = dma.hbm_to_vmem [thread:$0]  (!%p2301_p6), %s2664_s4, 256, %s404_s20, [#allocation9], %s2170_s24, %s2170_s24, %s2171_s16  }
  0x39   : > { %p1953_p10 = pnand %p1952_p9, %p1946_p2 }
  0x3b   : > { %1956 = shalt.err (!%p1953_p10)
}
  0x3c   : > { %s2665_s6 = sld [smem:[#allocation30_spill]]  ;;  %s2172_s20 = smov [#allocation11]  }
  0x3d   : > { %s435_s19 = sshll.u32 %s2172_s20, 4  ;;  %s436_s19 = int_to_ptr.vmem [resolvable:$true] %s435_s19 }
  0x3e   : > { %s1968_s21 = scalar_lea.vmem %s436_s19, 256  ;;  %p1976_p0 = scmp.lt.s32.totalorder %s436_s19, %s436_s19 }
  0x3f   : > { %p1969_p11 = scmp.ne.s32.totalorder %s436_s19, %s1968_s21  ;;  %p1977_p2 = scmp.lt.s32.totalorder %s1968_s21, %s1968_s21 }
  0x41   : > { %p1971_p12 = pnand %p1969_p11, %p1881_p7  ;;  %p1978_p4 = por %p1977_p2, %p1976_p0 }
  0x42   : > { %1762 = dma.hbm_to_vmem [thread:$0]  (!%p2301_p6), %s2665_s6, 256, %s420_s22, [#allocation9], %s2170_s24, %s2170_s24, %s2171_s16  }
  0x43   : > { %p1972_p13 = pneg %p1971_p12 }
  0x45   : > { %p1979_p8 = pnand %p1978_p4, %p1972_p13 }
  0x47   : > { %1982 = shalt.err (!%p1979_p8)
}
  0x48   : > { %s2666_s8 = sld [smem:[#allocation31_spill]]  ;;  %s1564_s18 = sadd.s32 4294967294, %s2165_s30  }
  0x49   : > { %s50_s17 = sadd.s32 1, %s2161_s29  ;;  %s59_s11 = sadd.s32 1, %s2153_s27 }
  0x4a   : > { %p52_p7 = scmp.ge.s32.totalorder %s50_s17, 2  ;;  %p66_p9 = scmp.ne.s32.totalorder %s2153_s27, %s2149_s26 }
  0x4b   : > { %p67_p10 = scmp.eq.s32.totalorder %s2165_s30, 0  ;;  %p72_p12 = scmp.ne.s32.totalorder %s2149_s26, %s2145_s25 }
  0x4c   : > { %s2692_s17 = smov (%p52_p7, %s50_s17), 0  ;;  %p340_p4 = scmp.eq.s32.totalorder %s1564_s18, 1 }
  0x4d   : > { %2667 = sst [smem:[#allocation25_spill]] %s2692_s17  ;;  %p2359_p11 = por %p67_p10, %p66_p9 }
  0x4e   : > { %1765 = dma.hbm_to_vmem [thread:$0]  (!%p2301_p6), %s2666_s8, 256, %s436_s19, [#allocation12], %s2170_s24, %s2170_s24, %s2171_s16  }
  0x4f   : > { %s54_s24 = ssub.s32 %s2161_s29, %s2692_s17  ;;  %p334_p6 = scmp.eq.s32.totalorder %s2287_s14, 1 }
  0x50   : > { %p57_p13 = scmp.eq.s32.totalorder %s54_s24, 0  ;;  %p2370_p0 = por %p2651_p1, %p72_p12 }
  0x51   : > { %p2374_p2 = por %p334_p6, %p66_p9  ;;  %p2381_p8 = por %p340_p4, %p72_p12 }
  0x52   : > { %s2379_s19 = scalar_select %p57_p13, %s2153_s27, %s59_s11  }
  0x53   : > { %p1784_p7 = scmp.lt.s32.totalorder %s2165_s30, 2  ;;  %s458_s22 = sand.u32 1, %s2153_s27  }
  0x54   : > { %2671 = sst [smem:[#allocation26_spill]] %s2379_s19  ;;  %s1572_s23 = sshll.u32 %s2161_s29, 7 }
  0x55   : > { %s1571_s24 = sshll.u32 %s458_s22, 3  ;;  %s2673_s0 = sld [smem:[#allocation27_spill]] }
  0x56   : > { %s462_s8 = scalar_lea.vmem [#allocation2], %s1571_s24  ;;  %p2393_p9 = pnand %p1784_p7, %p2359_p11 }
  0x57   : > { %s470_s17 = sshll.u32 %s462_s8, 4  ;;  %s2400_s19 = scalar_lea.hbm %s2634_s1, %s1572_s23  ;;  %s471_s17 = int_to_ptr.vmem [resolvable:$true] %s470_s17 }
  0x58   : > { %s459_s29 = scalar_lea.sflag [#allocation3], %s458_s22  ;;  %p1985_p10 = pneg %p2393_p9 }
  0x59   : > { %s1996_s2 = scalar_lea.vmem %s471_s17, 128  ;;  %s2173_s4 = smov [#allocation2]  }
  0x5a   : > { %p1997_p12 = scmp.ne.s32.totalorder %s471_s17, %s1996_s2  ;;  %s2001_s8 = sshll.u32 %s2173_s4, 4  ;;  %s2002_s8 = int_to_ptr.vmem [resolvable:$false] %s2001_s8 }
  0x5b   : > { %s468_s6 = scalar_lea.hbm %s2673_s0, %s1572_s23  ;;  %s2003_s12 = scalar_lea.vmem %s2002_s8, 256 }
  0x5c   : > { %p1999_p6 = pnand %p1997_p12, %p1985_p10  ;;  %p2004_p13 = scmp.lt.s32.totalorder %s471_s17, %s2002_s8 }
  0x5d   : > { %p2005_p4 = scmp.lt.s32.totalorder %s2003_s12, %s1996_s2 }
  0x5e   : > { %p2000_p11 = pneg %p1999_p6 }
  0x5f   : > { %p2006_p7 = por %p2005_p4, %p2004_p13 }
  0x61   : > { %p2007_p5 = pnand %p2006_p7, %p2000_p11 }
  0x63   : > { %2010 = shalt.err (!%p2007_p5)
}
  0x64   : > { %1769 = dma.hbm_to_vmem [thread:$0]  (!%p2393_p9), %s468_s6, 128, %s471_s17, %s459_s29  }
  0x65   : > { %s477_s22 = sand.u32 1, %s2165_s30   ;;  %s481_s23 = scalar_lea.vmem [#allocation5], %s1571_s24 }
  0x66   : > { %s488_s18 = sshll.u32 %s481_s23, 4  ;;  %s478_s11 = scalar_lea.sflag [#allocation6], %s477_s22  ;;  %s489_s18 = int_to_ptr.vmem [resolvable:$true] %s488_s18 }
  0x67   : > { %s2024_s0 = scalar_lea.vmem %s489_s18, 128  ;;  %s2174_s2 = smov [#allocation5]  }
  0x68   : > { %p2025_p12 = scmp.ne.s32.totalorder %s489_s18, %s2024_s0  ;;  %s2029_s4 = sshll.u32 %s2174_s2, 4  ;;  %s2030_s4 = int_to_ptr.vmem [resolvable:$false] %s2029_s4 }
  0x69   : > { %s2031_s8 = scalar_lea.vmem %s2030_s4, 256  ;;  %p2032_p5 = scmp.lt.s32.totalorder %s489_s18, %s2030_s4 }
  0x6a   : > { %p2027_p6 = pnand %p2025_p12, %p1985_p10  ;;  %p2033_p11 = scmp.lt.s32.totalorder %s2031_s8, %s2024_s0 }
  0x6c   : > { %p2028_p1 = pneg %p2027_p6  ;;  %p2034_p13 = por %p2033_p11, %p2032_p5 }
  0x6e   : > { %p2035_p4 = pnand %p2034_p13, %p2028_p1 }
  0x70   : > { %2038 = shalt.err (!%p2035_p4)
}
  0x71   : > { %1772 = dma.hbm_to_vmem [thread:$0]  (!%p2393_p9), %s2400_s19, 128, %s489_s18, %s478_s11  }
  0x72   : > { %497 = sbr.rel (%p2292_p3) target bundleno = 1675 (0x68b), region = 68  ;;  %s2419_s6 = sand.u32 (!%p2292_p3), 1, %s2149_s26  }
  0x73   : > { %s1576_s29 = sshll.u32 (!%p2292_p3), %s2419_s6, 3  ;;  %s500_s17 = scalar_lea.sflag (!%p2292_p3), [#allocation3], %s2419_s6 }
  0x74   : > { %s503_s24 = scalar_lea.vmem (!%p2292_p3), [#allocation2], %s1576_s29 }
  0x77   : > { %2116 = dma.done.wait (%p2370_p0), %s500_s17, 128  }
  0x78   : > { %2118 = vsyncadd (%p2370_p0), %s500_s17, 4294967168  ;;  %s508_s0 = sand.u32 1, %s2287_s14   ;;  %s512_s15 = scalar_lea.vmem [#allocation5], %s1576_s29 }
  0x79   : > { %s509_s25 = scalar_lea.sflag [#allocation6], %s508_s0 }
  0x7a   : > { %2120 = dma.done.wait (%p2370_p0), %s509_s25, 128  }
  0x7b   : > { %2122 = vsyncadd (%p2370_p0), %s509_s25, 4294967168  ;;  %p2675_p1 = scmp.eq.s32.totalorder %s2287_s14, 0 }
  0x7d   : > { %2124 = dma.done.wait (%p2675_p1), [#allocation6], 256   ;;  %p2676_p3 = pmov %p2675_p1 }
  0x7e   : > { %p2677_p9 = pmov %p2675_p1 }
  0x7f   : > { %2126 = vsyncadd (%p2676_p3), [#allocation6], 4294967040 }
  0x80   : > { %2128 = dma.done.wait (%p2677_p9), [#allocation9], 512   ;;  %p2678_p10 = pmov %p2675_p1 }
  0x81   : > { %p2679_p7 = pmov %p2675_p1 }
  0x82   : > { %2130 = vsyncadd (%p2678_p10), [#allocation9], 4294966784 }
  0x83   : > { %2132 = dma.done.wait (%p2679_p7), [#allocation12], 256   ;;  %p2680_p12 = pmov %p2675_p1 }
  0x84   : > { %v2175_v0 = vmov 0.0   ;;  %vm2176_vm0 = vmmov 0   ;;  %v1853_v1 = vld [vmem:[#allocation8 + $0x8] sm:$0xff]   ;;  %v1854_v2 = vld [vmem:[#allocation7 + $0x8] sm:$0xff]   ;;  %v1855_v3 = vld [vmem:[#allocation8] sm:$0xff]   ;;  %vm609_vm1 = vcmask 261120  }
  0x85   : > { %2134 = vsyncadd (%p2680_p12), [#allocation12], 4294967040  ;;  %1657 = vmatprep.subr.bf16.mxu1 %v2175_v0  ;;  %1649 = vmatprep.subr.bf16.mxu0 %v2175_v0  ;;  %v1856_v4 = vld [vmem:[#allocation7] sm:$0xff]   ;;  %v584_v5 = vld [vmem:[%s512_s15] sm:$0xff]  ;;  %vm785_vm2 = vcmask 64512   ;;  %s2177_s22 = smov 112  }
  0x86   : > { %1661 = vmatprep.mubr.msk.bf16.mxu1 %vm2176_vm0, %v2175_v0  ;;  %1653 = vmatprep.mubr.msk.bf16.mxu0 %vm2176_vm0, %v2175_v0  ;;  %v2452_v6 = vld [vmem:[%s503_s24] sm:$0xff]  ;;  %v585_v7 = vpack.c.bf16 %v584_v5, %v584_v5  ;;  %s2178_s23 = smov 120   ;;  %s2179_s18 = smov 104   ;;  %vm848_vm3 = vcmask 1043456   ;;  %vm1244_vm4 = vcmask 130048   ;;  %vm1246_vm5 = vcmask 195584  }
  0x87   : > { %1658 = vmatpush3.bf16.msra.mxu1 %v1853_v1  ;;  %1650 = vmatpush3.bf16.msra.mxu0 %v1854_v2  ;;  %v583_v8 = vpack.c.bf16 %v2452_v6, %v2452_v6  ;;  %v1588_v9 = vld [vmem:[%s2638_s5] ss:$0 sm:$0xff]  ;;  %v1857_v24 = vld [vmem:[#allocation10 + $0x8] sm:$0xff]   ;;  %s1583_s4 = sshll.u32 %s2419_s6, 5  ;;  %s2180_s29 = smov 8  }
  0x88   : > { %1659 = vmatprep.subr.bf16.mxu1 %v2175_v0  ;;  %1651 = vmatprep.subr.bf16.mxu0 %v2175_v0  ;;  %v1584_v10 = vld [vmem:[%s2636_s3] ss:$0 sm:$0xff]  ;;  %s2518_s8 = scalar_lea.vmem [#allocation14], %s1583_s4  ;;  %s2181_s17 = smov 16  }
  0x89   : > { %v1858_v25 = vld [vmem:[#allocation10] sm:$0xff]   ;;  %s2182_s24 = smov 24   ;;  %s1620_s15 = sshll.u32 %s2157_s28, 9 }
  0x8a   : > { %v1592_v40 = vld [vmem:[%s2640_s7] ss:$0 sm:$0xff]  ;;  %s1385_s14 = sshll.u32 %s2518_s8, 4  ;;  %s2558_s12 = scalar_lea.hbm %s2646_s13, %s1620_s15  ;;  %s2560_s14 = int_to_ptr.vmem [resolvable:$true] %s1385_s14 }
  0x8b   : > { %1660 = vmatpush3.bf16.msra.mxu1 %v1855_v3  ;;  %1652 = vmatpush3.bf16.msra.mxu0 %v1856_v4 }
  0x8c   : > { %1673 = vmatprep.subr.bf16.mxu1 %v2175_v0  ;;  %1665 = vmatprep.subr.bf16.mxu0 %v2175_v0 }
  0x8e   : > { %1662 = vmatmul.mubr.msk.bf16.vlgmr.msra.gmra.mxu1 %vm609_vm1, %v585_v7  ;;  %1654 = vmatmul.mubr.msk.bf16.vlgmr.msra.gmra.mxu0 %vm609_vm1, %v583_v8 }
  0x8f   : > { %1675 = vmatprep.mubr.msk.bf16.mxu1 %vm2176_vm0, %v2175_v0  ;;  %1669 = vmatprep.mubr.msk.bf16.mxu0 %vm2176_vm0, %v2175_v0 }
  0x90   : > { %1666 = vmatpush3.bf16.msra.mxu0 %v1857_v24 }
  0x91   : > { %1667 = vmatprep.subr.bf16.mxu0 %v2175_v0 }
  0x94   : > { %1668 = vmatpush3.bf16.msra.mxu0 %v1858_v25 }
  0x95   : > { %1679 = vmatprep.subr.bf16.mxu0 %v2175_v0 }
  0x97   : > { %1670 = vmatmul.mubr.msk.bf16.vlgmr.msra.gmra.mxu0 %vm609_vm1, %v585_v7 }
  0x98   : > { %1681 = vmatprep.mubr.msk.bf16.mxu0 %vm2176_vm0, %v2175_v0 }
 0x14e   : > { %v713_v11 = vpop.f32.mrf.mxu1  ;;  %v647_v13 = vpop.f32.mrf.mxu0 }
 0x14f   : > { %v714_v12 = vadd.f32 %v1588_v9, %v713_v11  ;;  %v648_v14 = vadd.f32 %v1584_v10, %v647_v13 }
 0x150   : > { %v1663_v15 = vpop.f32.mrf.mxu1  ;;  %v1655_v17 = vpop.f32.mrf.mxu0 }
 0x151   : > { %v783_v16 = vpack.c.bf16 %v714_v12, %v714_v12  ;;  %v782_v19 = vpack.c.bf16 %v648_v14, %v648_v14 }
 0x152   : > { %v716_v18 = vpop.f32.mrf.mxu1  ;;  %v650_v20 = vpop.f32.mrf.mxu0 }
 0x153   : > { %1009 = vrot.lane.b32.xlu1 %v783_v16, %s2177_s22  ;;  %896 = vrot.lane.b32.xlu0 %v783_v16, %s2178_s23  ;;  %v790_v21 = vsel %vm785_vm2, %v783_v16, 0 }
 0x154   : > { %v1664_v22 = vpop.f32.mrf.mxu1  ;;  %1674 = vmatpush3.bf16.xpose.msra.mxu1 %v790_v21  ;;  %v1656_v23 = vpop.f32.mrf.mxu0 }
 0x155   : > { %1685 = vmatprep.subr.bf16.mxu1 %v2175_v0 }
 0x157   : > { %1007 = vrot.lane.b32.xlu1 %v782_v19, %s2177_s22  ;;  %893 = vrot.lane.b32.xlu0 %v782_v19, %s2178_s23  ;;  %v776_v41 = vpop.f32.mrf.mxu0 }
 0x158   : > { %v777_v42 = vadd.f32 %v1592_v40, %v776_v41 }
 0x159   : > { %v1671_v43 = vpop.f32.mrf.mxu0 }
 0x15a   : > { %v784_v44 = vpack.c.bf16 %v777_v42, %v777_v42 }
 0x15b   : > { %1119 = vrot.lane.b32.xlu1 %v782_v19, %s2179_s18  ;;  %1121 = vrot.lane.b32.xlu0 %v783_v16, %s2179_s18  ;;  %v779_v45 = vpop.f32.mrf.mxu0 }
 0x15c   : > { %1676 = vmatmul.mubr.msk.bf16.vlgmr.msra.gmra.mxu1 %vm785_vm2, %v782_v19  ;;  %v850_v46 = vsel %vm848_vm3, %v784_v44, 0 }
 0x15d   : > { %1687 = vmatprep.mubr.msk.bf16.mxu1 %vm2176_vm0, %v2175_v0  ;;  %v1672_v47 = vpop.f32.mrf.mxu0  ;;  %1680 = vmatpush3.bf16.msra.mxu0 %v850_v46 }
 0x15e   : > { %1691 = vmatprep.subr.bf16.mxu0 %v2175_v0  ;;  %v1859_v47 = vld [vmem:[#allocation11 + $0x8] sm:$0xff]  }
 0x1c5   : > { %v897_v26 = vpop.permute.xlu0 %896  ;;  %v1010_v28 = vpop.permute.xlu1 %1009 }
 0x1c6   : > { %v902_v27 = vsel %vm785_vm2, %v897_v26, 0  ;;  %v1015_v30 = vsel %vm785_vm2, %v1010_v28, 0 }
 0x1c7   : > { %1686 = vmatpush3.bf16.xpose.msra.mxu1 %v902_v27 }
 0x1c8   : > { %1697 = vmatprep.subr.bf16.mxu1 %v2175_v0 }
 0x1c9   : > { %v894_v29 = vpop.permute.xlu0 %893  ;;  %v1008_v32 = vpop.permute.xlu1 %1007 }
 0x1cd   : > { %v1122_v31 = vpop.permute.xlu0 %1121  ;;  %v1120_v34 = vpop.permute.xlu1 %1119 }
 0x1ce   : > { %1688 = vmatmul.mubr.msk.bf16.vlgmr.msra.gmra.mxu1 %vm785_vm2, %v894_v29  ;;  %v1127_v33 = vsel %vm785_vm2, %v1122_v31, 0 }
 0x1cf   : > { %1698 = vmatpush3.bf16.xpose.msra.mxu1 %v1015_v30  ;;  %1699 = vmatprep.mubr.msk.bf16.mxu1 %vm2176_vm0, %v2175_v0 }
 0x1d0   : > { %1709 = vmatprep.subr.bf16.mxu1 %v2175_v0 }
 0x1d6   : > { %1700 = vmatmul.mubr.msk.bf16.vlgmr.msra.gmra.mxu1 %vm785_vm2, %v1008_v32 }
 0x1d7   : > { %1710 = vmatpush3.bf16.xpose.msra.mxu1 %v1127_v33  ;;  %1711 = vmatprep.mubr.msk.bf16.mxu1 %vm2176_vm0, %v2175_v0 }
 0x1d8   : > { %1721 = vmatprep.subr.bf16.mxu1 %v2175_v0 }
 0x1de   : > { %1712 = vmatmul.mubr.msk.bf16.vlgmr.msra.gmra.mxu1 %vm785_vm2, %v1120_v34 }
 0x1df   : > { %1725 = vmatprep.mubr.msk.bf16.mxu1 %vm2176_vm0, %v2175_v0  ;;  %1722 = vmatpush3.bf16.msra.mxu1 %v1859_v47 }
 0x1e0   : > { %1723 = vmatprep.subr.bf16.mxu1 %v2175_v0 }
 0x21c   : > { %v826_v35 = vpop.f32.mrf.mxu1 }
 0x21d   : > { %v832_v36 = vsel %vm785_vm2, %v826_v35, -inf }
 0x21e   : > { %833 = vmax.xlane.f32.xlu0 %v832_v36  ;;  %v1677_v37 = vpop.f32.mrf.mxu1 }
 0x220   : > { %v829_v38 = vpop.f32.mrf.mxu1 }
 0x222   : > { %v1678_v39 = vpop.f32.mrf.mxu1 }
 0x28e   : > { %v938_v48 = vpop.f32.mrf.mxu1 }
 0x28f   : > { %v944_v49 = vsel %vm785_vm2, %v938_v48, -inf }
 0x290   : > { %945 = vmax.xlane.f32.xlu1 %v944_v49  ;;  %v1689_v50 = vpop.f32.mrf.mxu1 }
 0x291   : > { %v1860_v50 = vld [vmem:[#allocation11] sm:$0xff]  }
 0x292   : > { %v941_v51 = vpop.f32.mrf.mxu1  ;;  %1724 = vmatpush3.bf16.msra.mxu1 %v1860_v50 }
 0x294   : > { %v1690_v52 = vpop.f32.mrf.mxu1 }
 0x296   : > { %v1051_v53 = vpop.f32.mrf.mxu1 }
 0x297   : > { %v1057_v54 = vsel %vm785_vm2, %v1051_v53, -inf }
 0x298   : > { %1058 = vmax.xlane.f32.xlu0 %v1057_v54  ;;  %v1701_v55 = vpop.f32.mrf.mxu1 }
 0x29a   : > { %v1054_v56 = vpop.f32.mrf.mxu1 }
 0x29c   : > { %v1702_v57 = vpop.f32.mrf.mxu1 }
 0x29e   : > { %v1163_v58 = vpop.f32.mrf.mxu1 }
 0x29f   : > { %v1169_v59 = vsel %vm785_vm2, %v1163_v58, -inf }
 0x2a0   : > { %1170 = vmax.xlane.f32.xlu0 %v1169_v59  ;;  %v1713_v60 = vpop.f32.mrf.mxu1 }
 0x2a2   : > { %v1166_v61 = vpop.f32.mrf.mxu1 }
 0x2a4   : > { %v1714_v62 = vpop.f32.mrf.mxu1 }
 0x2a7   : > { %v834_v63 = vpop.xlane.xlu0 %833 }
 0x2a8   : > { %v835_v1 = vsub.f32 %v826_v35, %v834_v63 }
 0x2aa   : > { %v836_v2 = vmul.f32 1.442695, %v835_v1 }
 0x2ac   : > { %1861 = vpow2.f32 %v836_v2 }
 0x2b9   : > { %v1862_v3 = vpop.eup %1861 }
 0x2ba   : > { %v838_v4 = vsel %vm785_vm2, %v1862_v3, 0.0 }
 0x2bb   : > { %839 = vadd.xlane.f32.xlu1 %v838_v4  ;;  %v1607_v4 = vld [vmem:[%s2642_s9] ss:$0 sm:$0xff] }
 0x2cc   : > { %959 = vrot.lane.b32.xlu1 %v784_v44, %s2178_s23  ;;  %s2039_s23 = scalar_lea.vmem %s2560_s14, 512 }
 0x2cd   : > { %p2040_p0 = scmp.ne.s32.totalorder %s2560_s14, %s2039_s23 }
 0x2cf   : > { %p2041_p6 = pnand %p2040_p0, %p2374_p2 }
 0x2d1   : > { %p2042_p5 = pneg %p2041_p6 }
 0x319   : > { %v946_v5 = vpop.xlane.xlu1 %945 }
 0x31a   : > { %v947_v7 = vsub.f32 %v938_v48, %v946_v5 }
 0x31c   : > { %v948_v8 = vmul.f32 1.442695, %v947_v7 }
 0x31e   : > { %1863 = vpow2.f32 %v948_v8 }
 0x321   : > { %v1059_v9 = vpop.xlane.xlu0 %1058 }
 0x322   : > { %v1060_v10 = vsub.f32 %v1051_v53, %v1059_v9 }
 0x324   : > { %v1061_v11 = vmul.f32 1.442695, %v1060_v10 }
 0x326   : > { %1865 = vpow2.f32 %v1061_v11 }
 0x329   : > { %v1171_v12 = vpop.xlane.xlu0 %1170 }
 0x32a   : > { %v1172_v13 = vsub.f32 %v1163_v58, %v1171_v12 }
 0x32b   : > { %v1864_v14 = vpop.eup %1863 }
 0x32c   : > { %v1173_v15 = vmul.f32 1.442695, %v1172_v13  ;;  %v950_v16 = vsel %vm785_vm2, %v1864_v14, 0.0 }
 0x32d   : > { %951 = vadd.xlane.f32.xlu0 %v950_v16 }
 0x32e   : > { %1867 = vpow2.f32 %v1173_v15 }
 0x333   : > { %v1866_v17 = vpop.eup %1865 }
 0x334   : > { %v1063_v18 = vsel %vm785_vm2, %v1866_v17, 0.0 }
 0x335   : > { %1064 = vadd.xlane.f32.xlu1 %v1063_v18 }
 0x33b   : > { %v1868_v19 = vpop.eup %1867 }
 0x33c   : > { %v1175_v20 = vsel %vm785_vm2, %v1868_v19, 0.0 }
 0x33d   : > { %1176 = vadd.xlane.f32.xlu0 %v1175_v20 }
 0x344   : > { %v840_v21 = vpop.xlane.xlu1 %839 }
 0x345   : > { %1869 = vrcp.f32 %v840_v21 }
 0x346   : > { %1183 = vrot.lane.b32.xlu1 %v784_v44, %s2179_s18  ;;  %s2183_s18 = smov [#allocation14]  }
 0x347   : > { %s2043_s11 = sshll.u32 %s2183_s18, 4  ;;  %s2044_s11 = int_to_ptr.vmem [resolvable:$false] %s2043_s11 }
 0x348   : > { %v960_v23 = vpop.permute.xlu1 %959  ;;  %s2045_s2 = scalar_lea.vmem %s2044_s11, 1024  ;;  %p2046_p11 = scmp.lt.s32.totalorder %s2560_s14, %s2044_s11 }
 0x349   : > { %v965_v26 = vsel %vm848_vm3, %v960_v23, 0  ;;  %p2047_p13 = scmp.lt.s32.totalorder %s2045_s2, %s2039_s23 }
 0x34b   : > { %p2048_p4 = por %p2047_p13, %p2046_p11 }
 0x34d   : > { %p2049_p1 = pnand %p2048_p4, %p2042_p5 }
 0x352   : > { %v1870_v22 = vpop.eup %1869 }
 0x353   : > { %1071 = vrot.lane.b32.xlu0 %v784_v44, %s2177_s22  ;;  %v842_v24 = vmul.f32 %v1870_v22, %v1862_v3  ;;  %s1357_s22 = scalar_lea.sflag [#allocation15], %s2419_s6 }
 0x355   : > { %843 = vst.msk [vmem:[%s2518_s8] sm:$0xff] %vm785_vm2, %v842_v24  ;;  %v844_v25 = vpack.c.bf16 %v842_v24, %v842_v24 }
 0x357   : > { %1682 = vmatmul.mubr.msk.bf16.vlgmr.msra.gmra.mxu0 %vm785_vm2, %v844_v25 }
 0x358   : > { %1692 = vmatpush3.bf16.msra.mxu0 %v965_v26  ;;  %1693 = vmatprep.mubr.msk.bf16.mxu0 %vm2176_vm0, %v2175_v0 }
 0x359   : > { %1703 = vmatprep.subr.bf16.mxu0 %v2175_v0 }
 0x3b6   : > { %v952_v27 = vpop.xlane.xlu0 %951 }
 0x3b7   : > { %1871 = vrcp.f32 %v952_v27 }
 0x3be   : > { %v1065_v28 = vpop.xlane.xlu1 %1064 }
 0x3bf   : > { %1873 = vrcp.f32 %v1065_v28 }
 0x3c2   : > { %v1184_v37 = vpop.permute.xlu1 %1183 }
 0x3c3   : > { %v1189_v39 = vsel %vm848_vm3, %v1184_v37, 0 }
 0x3c4   : > { %v1872_v29 = vpop.eup %1871 }
 0x3c5   : > { %v954_v30 = vmul.f32 %v1872_v29, %v1864_v14 }
 0x3c6   : > { %v1177_v31 = vpop.xlane.xlu0 %1176 }
 0x3c7   : > { %1875 = vrcp.f32 %v1177_v31  ;;  %1599 = vst.msk [vmem:[%s2518_s8 + $0x8] sm:$0xff] %vm785_vm2, %v954_v30  ;;  %v957_v32 = vpack.c.bf16 %v954_v30, %v954_v30 }
 0x3c9   : > { %1694 = vmatmul.mubr.msk.bf16.vlgmr.msra.gmra.mxu0 %vm785_vm2, %v957_v32 }
 0x3ca   : > { %v1072_v33 = vpop.permute.xlu0 %1071  ;;  %1705 = vmatprep.mubr.msk.bf16.mxu0 %vm2176_vm0, %v2175_v0 }
 0x3cb   : > { %v1077_v34 = vsel %vm848_vm3, %v1072_v33, 0 }
 0x3cc   : > { %v1874_v35 = vpop.eup %1873  ;;  %1704 = vmatpush3.bf16.msra.mxu0 %v1077_v34 }
 0x3cd   : > { %1715 = vmatprep.subr.bf16.mxu0 %v2175_v0  ;;  %v1067_v36 = vmul.f32 %v1874_v35, %v1866_v17 }
 0x3cf   : > { %1602 = vst.msk [vmem:[%s2518_s8 + $0x10] sm:$0xff] %vm785_vm2, %v1067_v36  ;;  %v1070_v38 = vpack.c.bf16 %v1067_v36, %v1067_v36 }
 0x3d1   : > { %1706 = vmatmul.mubr.msk.bf16.vlgmr.msra.gmra.mxu0 %vm785_vm2, %v1070_v38 }
 0x3d2   : > { %1716 = vmatpush3.bf16.msra.mxu0 %v1189_v39  ;;  %1717 = vmatprep.mubr.msk.bf16.mxu0 %vm2176_vm0, %v2175_v0 }
 0x3d4   : > { %v1876_v40 = vpop.eup %1875 }
 0x3d5   : > { %v1179_v41 = vmul.f32 %v1876_v40, %v1868_v19 }
 0x3d7   : > { %1605 = vst.msk [vmem:[%s2518_s8 + $0x18] sm:$0xff] %vm785_vm2, %v1179_v41  ;;  %v1182_v42 = vpack.c.bf16 %v1179_v41, %v1179_v41 }
 0x3d9   : > { %1718 = vmatmul.mubr.msk.bf16.vlgmr.msra.gmra.mxu0 %vm785_vm2, %v1182_v42 }
 0x417   : > { %v886_v43 = vpop.f32.mrf.mxu0 }
 0x419   : > { %v1683_v44 = vpop.f32.mrf.mxu0 }
 0x41b   : > { %v889_v45 = vpop.f32.mrf.mxu0 }
 0x41d   : > { %v1684_v46 = vpop.f32.mrf.mxu0 }
 0x489   : > { %v1001_v48 = vpop.f32.mrf.mxu0 }
 0x48a   : > { %1232 = vrot.lane.b32.xlu1 %v1001_v48, %s2180_s29 }
 0x48b   : > { %v1695_v49 = vpop.f32.mrf.mxu0 }
 0x48d   : > { %v1004_v51 = vpop.f32.mrf.mxu0 }
 0x48f   : > { %v1696_v52 = vpop.f32.mrf.mxu0 }
 0x491   : > { %v1113_v53 = vpop.f32.mrf.mxu0 }
 0x492   : > { %1236 = vrot.lane.b32.xlu0 %v1113_v53, %s2181_s17 }
 0x493   : > { %v1707_v54 = vpop.f32.mrf.mxu0 }
 0x495   : > { %v1116_v55 = vpop.f32.mrf.mxu0 }
 0x497   : > { %v1708_v56 = vpop.f32.mrf.mxu0 }
 0x499   : > { %v1225_v57 = vpop.f32.mrf.mxu0 }
 0x49a   : > { %1240 = vrot.lane.b32.xlu1 %v1225_v57, %s2182_s24 }
 0x49b   : > { %v1719_v58 = vpop.f32.mrf.mxu0 }
 0x49d   : > { %v1228_v0 = vpop.f32.mrf.mxu0 }
 0x49f   : > { %v1720_v59 = vpop.f32.mrf.mxu0 }
 0x4fc   : > { %v1233_v60 = vpop.permute.xlu1 %1232 }
 0x4fd   : > { %v1243_v62 = vsel %vm785_vm2, %v886_v43, %v1233_v60 }
 0x504   : > { %v1237_v61 = vpop.permute.xlu0 %1236 }
 0x505   : > { %v1245_v63 = vsel %vm1244_vm4, %v1243_v62, %v1237_v61 }
 0x50c   : > { %v1241_v1 = vpop.permute.xlu1 %1240 }
 0x50d   : > { %v1247_v2 = vsel %vm1246_vm5, %v1245_v63, %v1241_v1 }
 0x50e   : > { %v1248_v3 = vpack.c.bf16 %v1247_v2, %v1247_v2 }
 0x510   : > { %1726 = vmatmul.mubr.msk.bf16.vlgmr.msra.gmra.mxu1 %vm609_vm1, %v1248_v3 }
 0x5d0   : > { %v1309_v5 = vpop.f32.mrf.mxu1 }
 0x5d1   : > { %v1310_v7 = vadd.f32 %v1607_v4, %v1309_v5 }
 0x5d2   : > { %v1727_v8 = vpop.f32.mrf.mxu1 }
 0x5d3   : > { %v1315_v9 = vadd.f32 %v1310_v7, %v2452_v6 }
 0x5d4   : > { %v1312_v10 = vpop.f32.mrf.mxu1 }
 0x5d5   : > { %v1318_v11 = vsel %vm609_vm1, %v1315_v9, 0.0  ;;  %v1323_v12 = vmul.f32 %v1315_v9, %v1315_v9 }
 0x5d6   : > { %1319 = vadd.xlane.f32.xlu0 %v1318_v11  ;;  %v1728_v13 = vpop.f32.mrf.mxu1 }
 0x5d7   : > { %v1324_v14 = vsel %vm609_vm1, %v1323_v12, 0.0 }
 0x5d8   : > { %1325 = vadd.xlane.f32.xlu1 %v1324_v14 }
 0x5d9   : > { %2052 = shalt.err (!%p2049_p1)
}
 0x5da   : > { %s2053_s4 = scalar_lea.hbm %s2558_s12, 512  ;;  %s2057_s24 = scalar_lea.hbm %s2646_s13, 1024 }
 0x5db   : > { %p2054_p3 = scmp.ne.s32.totalorder %s2558_s12, %s2053_s4  ;;  %p2058_p7 = scmp.lt.s32.totalorder %s2558_s12, %s2646_s13 }
 0x5dc   : > { %p2059_p12 = scmp.lt.s32.totalorder %s2057_s24, %s2053_s4 }
 0x5dd   : > { %p2055_p9 = pnand %p2054_p3, %p2374_p2 }
 0x5de   : > { %p2060_p0 = por %p2059_p12, %p2058_p7 }
 0x5df   : > { %p2056_p10 = pneg %p2055_p9 }
 0x5e1   : > { %p2061_p6 = pnand %p2060_p0, %p2056_p10 }
 0x5e3   : > { %2064 = shalt.err (!%p2061_p6)
}
 0x5e4   : > { %s2184_s15 = smov 128   ;;  %s1582_s16 = sshll.u32 %s2419_s6, 2  ;;  %v1611_v23 = vld [vmem:[%s2643_s10] ss:$0 sm:$0xff]  ;;  %vm1349_vm6 = vcmask 257024  }
 0x5e5   : > { %1750 = dma.vmem_to_hbm [thread:$0]  (%p2374_p2), %s2560_s14, 512, %s2558_s12, %s1357_s22, %s2184_s15, %s2184_s15, %s2180_s29  }
 0x5e6   : > { %s2681_s12 = sld [smem:[#allocation32_spill]]  ;;  %s1615_s22 = sshll.u32 %s2157_s28, 6 }
 0x5e7   : > { %s573_s18 = scalar_lea.vmem [#allocation13], %s1582_s16  ;;  %s2682_s8 = sld [smem:[#allocation33_spill]] }
 0x5e8   : > { %s1371_s11 = sshll.u32 %s573_s18, 4  ;;  %s1352_s24 = scalar_lea.sflag [#allocation4], %s2419_s6  ;;  %s1372_s11 = int_to_ptr.vmem [resolvable:$true] %s1371_s11 }
 0x5e9   : > { %s2065_s0 = scalar_lea.vmem %s1372_s11, 64  ;;  %s2185_s25 = smov [#allocation13]  }
 0x5ea   : > { %p2066_p5 = scmp.ne.s32.totalorder %s1372_s11, %s2065_s0  ;;  %s2069_s15 = sshll.u32 %s2185_s25, 4  ;;  %s2070_s15 = int_to_ptr.vmem [resolvable:$false] %s2069_s15 }
 0x5eb   : > { %s2071_s28 = scalar_lea.vmem %s2070_s15, 128  ;;  %p2072_p4 = scmp.lt.s32.totalorder %s1372_s11, %s2070_s15 }
 0x5ec   : > { %v1612_v25 = vld [vmem:[%s2681_s12] ss:$0 sm:$0xff]  ;;  %p2067_p11 = pnand %p2066_p5, %p2374_p2  ;;  %p2073_p1 = scmp.lt.s32.totalorder %s2071_s28, %s2065_s0 }
 0x5ed   : > { %s1369_s17 = scalar_lea.hbm %s2682_s8, %s1615_s22 }
 0x5ee   : > { %p2068_p13 = pneg %p2067_p11  ;;  %p2074_p3 = por %p2073_p1, %p2072_p4 }
 0x5f0   : > { %p2075_p9 = pnand %p2074_p3, %p2068_p13 }
 0x65f   : > { %v1320_v6 = vpop.xlane.xlu0 %1319 }
 0x660   : > { %v1322_v15 = vmul.f32 0.03125, %v1320_v6 }
 0x661   : > { %v1326_v16 = vpop.xlane.xlu1 %1325 }
 0x662   : > { %v1328_v17 = vmul.f32 %v1322_v15, %v1322_v15  ;;  %v1327_v18 = vmul.f32 0.03125, %v1326_v16  ;;  %v1330_v21 = vsub.f32 %v1315_v9, %v1322_v15 }
 0x664   : > { %v1329_v19 = vsub.f32 %v1327_v18, %v1328_v17 }
 0x666   : > { %v1331_v20 = vadd.f32 1e-05, %v1329_v19 }
 0x668   : > { %1877 = vrsqrt.f32 %v1331_v20 }
 0x675   : > { %v1878_v22 = vpop.eup %1877 }
 0x676   : > { %v1333_v24 = vmul.f32 %v1878_v22, %v1330_v21 }
 0x678   : > { %v1340_v26 = vmul.f32 %v1611_v23, %v1333_v24 }
 0x67a   : > { %v1347_v27 = vadd.f32 %v1612_v25, %v1340_v26 }
 0x67c   : > { %v1348_v28 = vpack.c.bf16 %v1347_v27, %v1347_v27 }
 0x67e   : > { %1350 = vst.msk [vmem:[%s573_s18] sm:$0xf] %vm1349_vm6, %v1348_v28 }
 0x67f   : > { %2078 = shalt.err (!%p2075_p9)
}
 0x680   : > { %s2079_s16 = scalar_lea.hbm %s1369_s17, 64  ;;  %s2083_s23 = scalar_lea.hbm %s2682_s8, 128 }
 0x681   : > { %p2080_p10 = scmp.ne.s32.totalorder %s1369_s17, %s2079_s16  ;;  %p2084_p0 = scmp.lt.s32.totalorder %s1369_s17, %s2682_s8 }
 0x682   : > { %p2085_p6 = scmp.lt.s32.totalorder %s2083_s23, %s2079_s16 }
 0x683   : > { %p2081_p7 = pnand %p2080_p10, %p2374_p2 }
 0x684   : > { %p2086_p5 = por %p2085_p6, %p2084_p0 }
 0x685   : > { %p2082_p12 = pneg %p2081_p7 }
 0x687   : > { %p2087_p11 = pnand %p2086_p5, %p2082_p12 }
 0x689   : > { %2090 = shalt.err (!%p2087_p11)
}
 0x68a   : > { %1749 = dma.vmem_to_hbm [thread:$0]  (%p2374_p2), %s1372_s11, 64, %s1369_s17, %s1352_s24  }
 0x68b PF: > { %s2683_s12 = sld [smem:[#allocation23_spill]]  ;;  %p2684_p13 = scmp.ge.s32.totalorder %s2165_s30, 2 }
 0x68d   : > { %p1774_p4 = pnand %p2684_p13, %p2381_p8 }
 0x68f   : > { %p1775_p1 = pneg %p1774_p4 }
 0x691   : > { %s1400_s22 = sand.u32 1, %s2683_s12  }
 0x692   : > { %s1401_s18 = scalar_lea.sflag [#allocation4], %s1400_s22 }
 0x693   : > { %2136 = dma.done.wait (%p1775_p1), %s1401_s18, 64  }
 0x694   : > { %2138 = vsyncadd (%p1775_p1), %s1401_s18, 4294967232  ;;  %s1410_s2 = scalar_lea.sflag [#allocation15], %s1400_s22 }
 0x695   : > { %2140 = dma.done.wait (%p1775_p1), %s1410_s2, 512  }
 0x696   : > { %2142 = vsyncadd (%p1775_p1), %s1410_s2, 4294966784  ;;  %s38_s30 = sadd.s32 1, %s2165_s30   ;;  %s2685_s20 = sld [smem:[#allocation26_spill]] }
 0x697   : > { %p35_p3 = scmp.ge.s32.totalorder %s38_s30, 4   ;;  %s2686_s28 = sld [smem:[#allocation24_spill]] }
 0x698   : > { %s2687_s29 = sld [smem:[#allocation25_spill]]  ;;  %s2688_s25 = smov %s2149_s26 }
 0x699   : > { %s2689_s26 = smov %s2153_s27  ;;  %37 = sbr.rel (!%p35_p3) target bundleno = 20 (0x14), region = 162 }
 0x69c   : > { %s2690_s27 = smov %s2685_s20 }
 0x69e   :  { %1415 = vsyncpa [#allocation3], 1 }
 0x69f   :  { %1417 = vsyncpa [#allocation3 + $0x1], 1 }
 0x6a0   :  { %1418 = vsyncpa [#allocation6], 1 }
 0x6a1   :  { %1420 = vsyncpa [#allocation6 + $0x1], 1 }
 0x6a2   :  { %1421 = vsyncpa [#allocation9], 1 }
 0x6a3   :  { %1422 = vsyncpa [#allocation12], 1 }
 0x6a4   :  { %1423 = vsyncpa [#allocation4], 1 }
 0x6a5   :  { %1425 = vsyncpa [#allocation4 + $0x1], 1 }
 0x6a6   :  { %1426 = vsyncpa [#allocation15], 1 }
 0x6a7   :  { %1428 = vsyncpa [#allocation15 + $0x1], 1 }

</bundles_post_ra>
